<compile_context>
chip_gen: v7x
topology: tpu7x:2x2x1
jax: 0.10.0
libtpu: 0.0.40
codegen_flags: <defaults>
</compile_context>

<pallas_src>
import functools

import jax
import jax.numpy as jnp
from jax.experimental import pallas as pl
from jax.experimental.pallas import tpu as pltpu

_LANES = 128
_ACC_ROWS = 8                          # accumulator block: (8, 128) f32
_INPUT_BUFFER_BYTES = 8 * 1024 * 1024  # total double-buffered input DMA budget
_VMEM_LIMIT_BYTES = 32 * 1024 * 1024   # headroom for elementwise temporaries


def _cdiv(a, b):
    return -(-a // b)


def _round_up(x, m):
    return ((x + m - 1) // m) * m


def _sublane_align(dtype):
    """Minimum second-minor block alignment for a dtype (8/16/32 rows)."""
    bits = jnp.dtype(dtype).itemsize * 8
    if bits >= 32:
        return 8
    if bits == 16:
        return 16
    return 32


def _make_pow(gamma):
    """(1-pt)**gamma; small integer gamma -> repeated multiplies (no exp/log)."""
    g = float(gamma)
    if g == int(g) and 0 <= int(g) <= 8:
        n = int(g)

        def pow_fn(x):
            if n == 0:
                return jnp.ones_like(x)
            r = x
            for _ in range(n - 1):
                r = r * x
            return r

        return pow_fn
    return lambda x: x ** jnp.float32(g)


def _plan_tiles(rows, n_split, max_tile_rows, row_align):
    """Balanced tiling: pick block count first, then the smallest aligned tile."""
    bps = max(1, _cdiv(rows, n_split * max_tile_rows))          # blocks per split
    tile_rows = _round_up(_cdiv(rows, n_split * bps), row_align)
    tile_rows = min(tile_rows, max_tile_rows)
    return bps, tile_rows


def _focal_loss_kernel(p_ref, t_ref, out_ref, *, a0, a1, pow_fn, valid_rows,
                       tile_rows, blocks_per_split, apply_alpha, ragged):
    i = pl.program_id(1)

    @pl.when(i == 0)
    def _():
        out_ref[...] = jnp.zeros_like(out_ref)

    p = p_ref[...].astype(jnp.float32)
    is_pos = t_ref[...] != 0          # native-dtype compare (bool/int8/float)

    # For binary targets: pt = p (t==1) or 1-p (t==0). This equals exp(-BCE) up
    # to the e^-100 log clamp, whose effect on (1-pt) is < 4e-44 (negligible).
    pt = jnp.where(is_pos, p, 1.0 - p)

    if ragged:
        # Mask rows past the real data (partial last block reads garbage).
        # pt -> 1 gives bce = 0, so the masked contribution is exactly 0 and any
        # NaN/Inf from garbage bytes is discarded by the select.
        base_row = (pl.program_id(0) * blocks_per_split + i) * tile_rows
        row_idx = base_row + jax.lax.broadcasted_iota(jnp.int32, p.shape, 0)
        pt = jnp.where(row_idx < valid_rows, pt, jnp.float32(1.0))

    # Same clamp F.binary_cross_entropy applies to its log terms (log >= -100).
    bce = jnp.minimum(-jnp.log(pt), jnp.float32(100.0))
    f_loss = pow_fn(1.0 - pt) * bce
    if apply_alpha:
        at = jnp.where(is_pos, jnp.float32(a1), jnp.float32(a0))
        f_loss = at * f_loss

    # Fold the (tile_rows, 128) tile onto the resident (8, 128) output block with
    # plain VPU adds; the single cross-lane reduce happens in the wrapper.
    # TODO(synk): for N >~ 1e8 consider pairwise accumulation for tighter f32 error.
    out_ref[...] += f_loss.reshape(-1, out_ref.shape[0], out_ref.shape[1]).sum(axis=0)


def focal_loss(inputs, targets, *, gamma=2.0, alpha=0.5):
    """Pallas TPU focal loss. `inputs` are probabilities in [0,1], `targets` in {0,1}.

    Targets may be bool/int8/float; they are streamed in their native dtype.
    """
    total_n = int(inputs.size)
    p_flat = inputs.reshape(-1)
    t_flat = targets.reshape(-1)

    # Only a sub-128-element zero pad is ever added (p=0, t=0 => pt=1 => bce=0,
    # i.e. zero contribution).  When total_n is a multiple of 128 -- the common
    # case -- no copy of the inputs happens at all (reshape is a free bitcast).
    rem = total_n % _LANES
    if rem:
        pad = _LANES - rem
        p_flat = jnp.concatenate([p_flat, jnp.zeros((pad,), p_flat.dtype)])
        t_flat = jnp.concatenate([t_flat, jnp.zeros((pad,), t_flat.dtype)])

    rows = p_flat.size // _LANES
    p2d = p_flat.reshape(rows, _LANES)
    t2d = t_flat.reshape(rows, _LANES)

    row_align = max(_sublane_align(p2d.dtype), _sublane_align(t2d.dtype))

    # Byte-budgeted tiles: keep 2 inputs x 2 pipeline buffers under the budget,
    # whatever the dtypes (4096 rows for f32+f32; more for narrower targets).
    bytes_per_row = _LANES * (p2d.dtype.itemsize + t2d.dtype.itemsize)
    max_tile_rows = (_INPUT_BUFFER_BYTES // (2 * bytes_per_row)) // row_align * row_align
    max_tile_rows = max(row_align, max_tile_rows)

    # Shard the reduction across v7x's two TensorCores even for mid-size inputs
    # (harmless on 1-TC v5e/v6e).
    n_split = 2 if rows >= 2 * row_align else 1
    bps, tile_rows = _plan_tiles(rows, n_split, max_tile_rows, row_align)
    if n_split > 1 and (n_split * bps - 1) * tile_rows >= rows:
        # Would create a fully out-of-bounds block; fall back to one split.
        n_split = 1
        bps, tile_rows = _plan_tiles(rows, 1, max_tile_rows, row_align)

    ragged = (n_split * bps * tile_rows) != rows

    alpha_f = float(alpha)
    uniform_alpha = (alpha_f == 1.0 - alpha_f)   # alpha == 0.5: fold into mean

    kernel = functools.partial(
        _focal_loss_kernel,
        a0=alpha_f,
        a1=1.0 - alpha_f,
        pow_fn=_make_pow(gamma),
        valid_rows=rows,
        tile_rows=tile_rows,
        blocks_per_split=bps,
        apply_alpha=not uniform_alpha,
        ragged=ragged,
    )

    in_map = lambda s, i: (s * bps + i, 0)

    partial_sums = pl.pallas_call(
        kernel,
        out_shape=jax.ShapeDtypeStruct((n_split * _ACC_ROWS, _LANES), jnp.float32),
        grid_spec=pltpu.PrefetchScalarGridSpec(
            num_scalar_prefetch=0,
            grid=(n_split, bps),
            in_specs=[
                pl.BlockSpec((tile_rows, _LANES), in_map),
                pl.BlockSpec((tile_rows, _LANES), in_map),
            ],
            out_specs=pl.BlockSpec((_ACC_ROWS, _LANES), lambda s, i: (s, 0)),
        ),
        compiler_params=pltpu.CompilerParams(
            dimension_semantics=("parallel", "arbitrary"),
            vmem_limit_bytes=_VMEM_LIMIT_BYTES,
        ),
    )(p2d, t2d)

    # Final cross-lane reduce + mean on a tiny (8*n_split, 128) array.
    mean_scale = (alpha_f if uniform_alpha else 1.0) / float(total_n)
    return jnp.sum(partial_sums) * jnp.float32(mean_scale)


def focal_loss_ref(inputs, targets, *, gamma=2.0, alpha=0.5):
    """Pure-JAX reference mirroring the PyTorch forward."""
    p = inputs.astype(jnp.float32)
    t = targets.astype(jnp.float32)
    log_p = jnp.maximum(jnp.log(p), -100.0)
    log_1mp = jnp.maximum(jnp.log(1.0 - p), -100.0)
    bce = -(t * log_p + (1.0 - t) * log_1mp)
    alpha_vec = jnp.array([alpha, 1.0 - alpha], dtype=jnp.float32)
    at = alpha_vec[t.astype(jnp.int32)]
    pt = jnp.exp(-bce)
    return jnp.mean(at * (1.0 - pt) ** gamma * bce)


if __name__ == "__main__":
    key = jax.random.PRNGKey(0)
    k1, k2, k3, k4 = jax.random.split(key, 4)

    # Primary check: NCHW probabilities + binary float targets, default gamma/alpha.
    x = jax.random.uniform(k1, (2, 4, 16, 16), dtype=jnp.float32, minval=0.01, maxval=0.99)
    y = (jax.random.uniform(k2, (2, 4, 16, 16)) > 0.5).astype(jnp.float32)

    loss = focal_loss(x, y, gamma=2.0, alpha=0.5)
    loss = jax.block_until_ready(loss)
    ref = focal_loss_ref(x, y, gamma=2.0, alpha=0.5)
    assert jnp.allclose(loss, ref, rtol=1e-5, atol=1e-6), (loss, ref)

    # Secondary check: non-128-divisible size, narrow int8 targets, alpha != 0.5,
    # integer gamma = 3 -> exercises the in-kernel ragged mask + alpha select path.
    x2 = jax.random.uniform(k3, (3, 5, 21), dtype=jnp.float32, minval=0.01, maxval=0.99)
    y2 = (jax.random.uniform(k4, (3, 5, 21)) > 0.5).astype(jnp.int8)
    loss2 = jax.block_until_ready(focal_loss(x2, y2, gamma=3.0, alpha=0.25))
    ref2 = focal_loss_ref(x2, y2, gamma=3.0, alpha=0.25)
    assert jnp.allclose(loss2, ref2, rtol=1e-5, atol=1e-6), (loss2, ref2)

    print("KERNEL_OK")
</pallas_src>

<mosaic_0001>
module attributes {stable_mosaic.version = 11 : i64} {
  func.func @_focal_loss_kernel(%arg0: i32, %arg1: i32, %arg2: memref<8x128xf32, #tpu.memory_space<vmem>>, %arg3: memref<8x128xf32, #tpu.memory_space<vmem>>, %arg4: memref<8x128xf32, #tpu.memory_space<vmem>>) attributes {dimension_semantics = [#tpu.dimension_semantics<parallel>, #tpu.dimension_semantics<arbitrary>], iteration_bounds = array<i64: 2, 1>, scalar_prefetch = 0 : i64, scratch_operands = 0 : i64, tpu.core_type = #tpu.core_type<tc>, window_params = [{transform_indices = @transform_0, window_bounds = array<i64: 8, 128>}, {transform_indices = @transform_1, window_bounds = array<i64: 8, 128>}, {transform_indices = @transform_2, window_bounds = array<i64: 8, 128>}]} {
    %c0_i32 = arith.constant 0 : i32
    %0 = arith.cmpi eq, %arg1, %c0_i32 : i32
    %1 = arith.extui %0 : i1 to i32
    %c0_i32_0 = arith.constant 0 : i32
    %2 = arith.cmpi ne, %1, %c0_i32_0 : i32
    scf.if %2 {
      %cst_13 = arith.constant 0.000000e+00 : f32
      %24 = vector.broadcast %cst_13 : f32 to vector<8x128xf32>
      %c0_14 = arith.constant 0 : index
      %c0_15 = arith.constant 0 : index
      %25 = vector.load %arg4[%c0_14, %c0_15] : memref<8x128xf32, #tpu.memory_space<vmem>>, vector<8x128xf32>
      tpu.vector_store %arg4[%c0_14, %c0_15], %24 {strides = array<i32>} : memref<8x128xf32, #tpu.memory_space<vmem>>, vector<8x128xf32>,
    } else {
    }
    %c0 = arith.constant 0 : index
    %c0_1 = arith.constant 0 : index
    %3 = vector.load %arg2[%c0, %c0_1] : memref<8x128xf32, #tpu.memory_space<vmem>>, vector<8x128xf32>
    %c0_2 = arith.constant 0 : index
    %c0_3 = arith.constant 0 : index
    %4 = vector.load %arg3[%c0_2, %c0_3] : memref<8x128xf32, #tpu.memory_space<vmem>>, vector<8x128xf32>
    %cst = arith.constant 0.000000e+00 : f32
    %5 = vector.broadcast %cst : f32 to vector<8x128xf32>
    %6 = arith.cmpf one, %4, %5 : vector<8x128xf32>
    %cst_4 = arith.constant 1.000000e+00 : f32
    %7 = vector.broadcast %cst_4 : f32 to vector<8x128xf32>
    %8 = arith.subf %7, %3 : vector<8x128xf32>
    %9 = arith.select %6, %3, %8 : vector<8x128xi1>, vector<8x128xf32>
    %10 = math.log %9 : vector<8x128xf32>
    %cst_5 = arith.constant 0.000000e+00 : f32
    %11 = vector.broadcast %cst_5 : f32 to vector<8x128xf32>
    %12 = arith.subf %11, %10 : vector<8x128xf32>
    %cst_6 = arith.constant 1.000000e+02 : f32
    %13 = vector.broadcast %cst_6 : f32 to vector<8x128xf32>
    %14 = arith.minimumf %12, %13 : vector<8x128xf32>
    %cst_7 = arith.constant 1.000000e+00 : f32
    %15 = vector.broadcast %cst_7 : f32 to vector<8x128xf32>
    %16 = arith.subf %15, %9 : vector<8x128xf32>
    %17 = arith.mulf %16, %16 : vector<8x128xf32>
    %18 = arith.mulf %17, %14 : vector<8x128xf32>
    %c0_8 = arith.constant 0 : index
    %c0_9 = arith.constant 0 : index
    %19 = vector.load %arg4[%c0_8, %c0_9] : memref<8x128xf32, #tpu.memory_space<vmem>>, vector<8x128xf32>
    %20 = vector.shape_cast %18 : vector<8x128xf32> to vector<1x8x128xf32>
    %cst_10 = arith.constant dense<0.000000e+00> : vector<8x128xf32>
    %21 = vector.multi_reduction <add>, %20, %cst_10 [0] : vector<1x8x128xf32> to vector<8x128xf32>
    %22 = arith.addf %19, %21 : vector<8x128xf32>
    %c0_11 = arith.constant 0 : index
    %c0_12 = arith.constant 0 : index
    %23 = vector.load %arg4[%c0_11, %c0_12] : memref<8x128xf32, #tpu.memory_space<vmem>>, vector<8x128xf32>
    tpu.vector_store %arg4[%c0_11, %c0_12], %22 {strides = array<i32>} : memref<8x128xf32, #tpu.memory_space<vmem>>, vector<8x128xf32>,
    return
  }
  func.func @transform_0(%arg0: i32, %arg1: i32) -> (i32, i32) {
    %c1_i32 = arith.constant 1 : i32
    %0 = arith.muli %arg0, %c1_i32 : i32
    %1 = arith.addi %0, %arg1 : i32
    %c0_i32 = arith.constant 0 : i32
    %c0_i32_0 = arith.constant 0 : i32
    return %1, %c0_i32 : i32, i32
  }
  func.func @transform_1(%arg0: i32, %arg1: i32) -> (i32, i32) {
    %c1_i32 = arith.constant 1 : i32
    %0 = arith.muli %arg0, %c1_i32 : i32
    %1 = arith.addi %0, %arg1 : i32
    %c0_i32 = arith.constant 0 : i32
    %c0_i32_0 = arith.constant 0 : i32
    return %1, %c0_i32 : i32, i32
  }
  func.func @transform_2(%arg0: i32, %arg1: i32) -> (i32, i32) {
    %c0_i32 = arith.constant 0 : i32
    %c0_i32_0 = arith.constant 0 : i32
    return %arg0, %c0_i32 : i32, i32
  }
}

</mosaic_0001>

<bundles_post_ra>
// kernel: tpu_custom_call.1
= control target key start
LH: loop header
LB: loop body
LE: loop exit
PB: predicated region body
PF: predicated region fallthrough
CT: control target
= control target key end

     0   :  { %7 = vsyncpa [#allocation3], 0  ;;  %s826_s0 = inlined_call_operand.hbm [shape: f32[16,128], index: 0, kind: input, shape index: {}]   ;;  %s827_s1 = inlined_call_operand.hbm [shape: f32[16,128], index: 1, kind: input, shape index: {}]   ;;  %s828_s2 = inlined_call_operand.hbm [shape: f32[16,128], index: 2, kind: output, shape index: {}]  }
   0x1   :  { %9 = vsyncpa [#allocation3 + $0x1], 0 }
   0x2   :  { %10 = vsyncpa [#allocation6], 0 }
   0x3   :  { %12 = vsyncpa [#allocation6 + $0x1], 0 }
   0x4   :  { %13 = vsyncpa [#allocation4], 0 }
   0x5   :  { %15 = vsyncpa [#allocation4 + $0x1], 0  ;;  %s606_s9 = smov 0   ;;  %s608_s10 = smov 0  }
   0x6   :  { %s610_s11 = smov 0   ;;  %s612_s12 = smov 0  }
   0x7   :  { %s614_s13 = smov 0   ;;  %s616_s14 = smov 0  }
   0x8 LB: > { %s354_s15 = sadd.s32 4294967295, %s586_s14   ;;  %s355_s16 = sadd.s32 4294967294, %s586_s14   ;;  %s586_s14 = sphi %s616_s14, %s21_s14   ;;  %s582_s13 = sphi %s614_s13, %s848_s13   ;;  %s578_s12 = sphi %s612_s12, %s847_s12   ;;  %s574_s11 = sphi %s610_s11, %s846_s11   ;;  %s570_s10 = sphi %s608_s10, %s845_s10   ;;  %s566_s9 = sphi %s606_s9, %s844_s9  }
   0x9   : > { %s33_s17 = sadd.s32 1, %s582_s13  ;;  %s42_s18 = sadd.s32 1, %s574_s11 }
   0xa   : > { %p35_p0 = scmp.ge.s32.totalorder %s33_s17, 2  ;;  %p49_p1 = scmp.ne.s32.totalorder %s574_s11, %s570_s10 }
   0xb   : > { %p50_p2 = scmp.eq.s32.totalorder %s586_s14, 0  ;;  %p55_p3 = scmp.ne.s32.totalorder %s570_s10, %s566_s9 }
   0xc   : > { %s850_s17 = smov (%p35_p0, %s33_s17), 0  ;;  %p56_p5 = scmp.eq.s32.totalorder %s354_s15, 0 }
   0xd   : > { %p647_p4 = por %p50_p2, %p49_p1  ;;  %s39_s20 = ssub.s32 %s582_s13, %s850_s17 }
   0xe   : > { %p107_p6 = scmp.eq.s32.totalorder %s354_s15, 1  ;;  %p40_p7 = scmp.eq.s32.totalorder %s39_s20, 0 }
   0xf   : > { %p653_p8 = por %p56_p5, %p55_p3  ;;  %p113_p10 = scmp.eq.s32.totalorder %s355_s16, 1 }
  0x10   : > { %p657_p9 = por %p107_p6, %p49_p1  ;;  %p387_p13 = scmp.lt.s32.totalorder %s586_s14, 2 }
  0x11   : > { %s832_s21 = scalar_select %p653_p8, 1, 0 }
  0x12   : > { %s833_s22 = scalar_select %p657_p9, 1, 0 }
  0x13   : > { %s662_s23 = scalar_select %p40_p7, %s574_s11, %s42_s18  }
  0x14   : > { %p664_p11 = por %p113_p10, %p55_p3  ;;  %s671_s25 = sand.u32 1, %s574_s11  }
  0x15   : > { %s358_s26 = sshll.u32 %s671_s25, 3  ;;  %s359_s27 = sshll.u32 %s582_s13, 7 }
  0x16   : > { %s834_s24 = scalar_select %p664_p11, 1, 0 }
  0x17   : > { %s680_s30 = scalar_lea.hbm %s826_s0, %s359_s27  ;;  %s137_s3 = scalar_lea.vmem [#allocation2], %s358_s26 }
  0x18   : > { %s145_s4 = sshll.u32 %s137_s3, 4  ;;  %p688_p0 = pnand %p387_p13, %p647_p4  ;;  %s684_s4 = int_to_ptr.vmem [resolvable:$true] %s145_s4 }
  0x19   : > { %s134_s6 = scalar_lea.sflag [#allocation3], %s671_s25  ;;  %s440_s7 = scalar_lea.hbm %s680_s30, 128 }
  0x1a   : > { %p441_p3 = scmp.ne.s32.totalorder %s680_s30, %s440_s7  ;;  %p442_p5 = pneg %p688_p0 }
  0x1b   : > { %s445_s16 = scalar_lea.hbm %s826_s0, 256  ;;  %p446_p4 = scmp.lt.u32.totalorder %s680_s30, %s826_s0 }
  0x1c   : > { %p443_p6 = pnand %p442_p5, %p441_p3  ;;  %p447_p10 = scmp.lt.u32.totalorder %s445_s16, %s440_s7 }
  0x1d   : > { %p449_p12 = scmp.lt.u32.totalorder %s440_s7, %s680_s30 }
  0x1e   : > { %p444_p7 = pneg %p443_p6  ;;  %p448_p13 = por %p447_p10, %p446_p4 }
  0x20   : > { %p450_p1 = por %p449_p12, %p448_p13 }
  0x22   : > { %p451_p2 = pnand %p450_p1, %p444_p7 }
  0x24   : > { %454 = shalt.err (!%p451_p2)
}
  0x25   : > { %s455_s20 = scalar_lea.vmem %s684_s4, 128  ;;  %s588_s28 = smov [#allocation2]  }
  0x26   : > { %p456_p3 = scmp.ne.s32.totalorder %s684_s4, %s455_s20  ;;  %s460_s29 = sshll.u32 %s588_s28, 4  ;;  %s461_s29 = int_to_ptr.vmem [resolvable:$false] %s460_s29 }
  0x27   : > { %s462_s3 = scalar_lea.vmem %s461_s29, 256  ;;  %p463_p9 = scmp.lt.s32.totalorder %s684_s4, %s461_s29 }
  0x28   : > { %p458_p6 = pnand %p456_p3, %p442_p5  ;;  %p464_p4 = scmp.lt.s32.totalorder %s462_s3, %s455_s20 }
  0x2a   : > { %p459_p11 = pneg %p458_p6  ;;  %p465_p10 = por %p464_p4, %p463_p9 }
  0x2c   : > { %p466_p12 = pnand %p465_p10, %p459_p11 }
  0x2e   : > { %469 = shalt.err (!%p466_p12)
}
  0x2f   : > { %379 = dma.hbm_to_vmem [thread:$0]  (!%p688_p0), %s680_s30, 128, %s684_s4, %s134_s6  }
  0x30   : > { %p836_p1 = scmp.lt.s32.totalorder %s586_s14, 3  ;;  %p837_p2 = scmp.ge.s32.totalorder %s586_s14, 1 }
  0x31   : > { %s733_s16 = scalar_lea.hbm %s827_s1, %s359_s27  ;;  %s156_s18 = scalar_lea.vmem [#allocation5], %s358_s26 }
  0x32   : > { %p724_p7 = pnand %p837_p2, %p836_p1  ;;  %s164_s19 = sshll.u32 %s156_s18, 4  ;;  %s165_s19 = int_to_ptr.vmem [resolvable:$true] %s164_s19 }
  0x33   : > { %s153_s30 = scalar_lea.sflag [#allocation6], %s671_s25  ;;  %s470_s4 = scalar_lea.hbm %s733_s16, 128 }
  0x34   : > { %s838_s7 = scalar_select %p724_p7, 1, 0 }
  0x35   : > { %p471_p9 = scmp.ne.s32.totalorder %s733_s16, %s470_s4  ;;  %s475_s27 = scalar_lea.hbm %s827_s1, 256 }
  0x36   : > { %p476_p3 = scmp.lt.u32.totalorder %s733_s16, %s827_s1  ;;  %p477_p6 = scmp.lt.u32.totalorder %s475_s27, %s470_s4 }
  0x37   : > { %p473_p11 = pnand %p471_p9, %p442_p5  ;;  %p479_p10 = scmp.lt.u32.totalorder %s470_s4, %s733_s16 }
  0x38   : > { %p478_p4 = por %p477_p6, %p476_p3 }
  0x39   : > { %p474_p13 = pneg %p473_p11 }
  0x3a   : > { %p480_p12 = por %p479_p10, %p478_p4 }
  0x3c   : > { %p481_p1 = pnand %p480_p12, %p474_p13 }
  0x3e   : > { %484 = shalt.err (!%p481_p1)
}
  0x3f   : > { %s485_s25 = scalar_lea.vmem %s165_s19, 128  ;;  %s589_s26 = smov [#allocation5]  }
  0x40   : > { %p486_p2 = scmp.ne.s32.totalorder %s165_s19, %s485_s25  ;;  %s490_s3 = sshll.u32 %s589_s26, 4  ;;  %s491_s3 = int_to_ptr.vmem [resolvable:$false] %s490_s3 }
  0x41   : > { %s492_s8 = scalar_lea.vmem %s491_s3, 256  ;;  %p493_p8 = scmp.lt.s32.totalorder %s165_s19, %s491_s3 }
  0x42   : > { %p488_p9 = pnand %p486_p2, %p442_p5  ;;  %p494_p7 = scmp.lt.s32.totalorder %s492_s8, %s485_s25 }
  0x44   : > { %p489_p11 = pneg %p488_p9  ;;  %p495_p3 = por %p494_p7, %p493_p8 }
  0x46   : > { %p496_p6 = pnand %p495_p3, %p489_p11 }
  0x48   : > { %499 = shalt.err (!%p496_p6)
}
  0x49   : > { %382 = dma.hbm_to_vmem [thread:$0]  (!%p688_p0), %s733_s16, 128, %s165_s19, %s153_s30  }
  0x4a   : > { %p839_p13 = scmp.ne.s32.totalorder %s838_s7, 0 }
  0x4b   : > { %s760_s15 = sand.u32 (!%p839_p13), 1, %s570_s10   ;;  %p840_p5 = scmp.ne.s32.totalorder (!%p839_p13), %s832_s21, 0 }
  0x4c   : > { %173 = sbr.rel (%p839_p13) target bundleno = 123 (0x7b), region = 28  ;;  %s363_s18 = sshll.u32 (!%p839_p13), %s760_s15, 3 }
  0x4d   : > { %s176_s4 = scalar_lea.sflag (!%p839_p13), [#allocation3], %s760_s15  ;;  %s179_s6 = scalar_lea.vmem (!%p839_p13), [#allocation2], %s363_s18 }
  0x53   : > { %553 = dma.done.wait (%p840_p5), %s176_s4, 128  }
  0x54   : > { %555 = vsyncadd (%p840_p5), %s176_s4, 4294967168  ;;  %s185_s5 = scalar_lea.sflag [#allocation6], %s760_s15  ;;  %s188_s16 = scalar_lea.vmem [#allocation5], %s363_s18 }
  0x55   : > { %557 = dma.done.wait (%p840_p5), %s185_s5, 128  }
  0x56   : > { %559 = vsyncadd (%p840_p5), %s185_s5, 4294967168  ;;  %v221_v0 = vld [vmem:[%s179_s6] sm:$0xff]  ;;  %v222_v1 = vld [vmem:[%s188_s16] sm:$0xff]  ;;  %s367_s7 = sshll.u32 %s578_s12, 7  ;;  %s213_s19 = scalar_lea.vmem [#allocation7], %s363_s18 }
  0x57   : > { %vm223_vm0 = vcmp.ne.f32.partialorder %v222_v1, 0.0  ;;  %v224_v2 = vsub.f32 1.0, %v221_v0  ;;  %s251_s30 = sshll.u32 %s213_s19, 4  ;;  %s777_s27 = scalar_lea.hbm %s828_s2, %s367_s7  ;;  %s779_s30 = int_to_ptr.vmem [resolvable:$true] %s251_s30 }
  0x58   : > { %s238_s28 = scalar_lea.sflag [#allocation4], %s760_s15  ;;  %s500_s29 = scalar_lea.vmem %s779_s30, 128 }
  0x59   : > { %v225_v3 = vsel %vm223_vm0, %v221_v0, %v224_v2  ;;  %p501_p8 = scmp.ne.s32.totalorder %s779_s30, %s500_s29  ;;  %p841_p0 = scmp.ne.s32.totalorder %s833_s22, 0 }
  0x5a   : > { %438 = vlog2.f32 %v225_v3  ;;  %v230_v4 = vsub.f32 1.0, %v225_v3  ;;  %s590_s12 = smov [#allocation7]  }
  0x5b   : > { %p502_p7 = pnand %p501_p8, %p841_p0  ;;  %s504_s25 = sshll.u32 %s590_s12, 4  ;;  %s505_s25 = int_to_ptr.vmem [resolvable:$false] %s504_s25 }
  0x5c   : > { %v231_v8 = vmul.f32 %v230_v4, %v230_v4  ;;  %s506_s26 = scalar_lea.vmem %s505_s25, 256  ;;  %p507_p10 = scmp.lt.s32.totalorder %s779_s30, %s505_s25 }
  0x5d   : > { %p503_p4 = pneg %p502_p7  ;;  %p508_p12 = scmp.lt.s32.totalorder %s506_s26, %s500_s29 }
  0x5f   : > { %p509_p1 = por %p508_p12, %p507_p10 }
  0x61   : > { %p510_p2 = pnand %p509_p1, %p503_p4 }
  0x64   : > { %v439_v5 = vpop.eup %438 }
  0x65   : > { %v227_v6 = vmul.f32 0.6931472, %v439_v5 }
  0x67   : > { %v228_v7 = vsub.f32 0.0, %v227_v6 }
  0x69   : > { %v229_v9 = vmin.f32 %v228_v7, 100.0 }
  0x6b   : > { %v232_v10 = vmul.f32 %v231_v8, %v229_v9 }
  0x6d   : > { %236 = vst [vmem:[%s213_s19] sm:$0xff] %v232_v10 }
  0x6e   : > { %513 = shalt.err (!%p510_p2)
}
  0x6f   : > { %s514_s3 = scalar_lea.hbm %s777_s27, 128  ;;  %s518_s18 = scalar_lea.hbm %s828_s2, 256 }
  0x70   : > { %p515_p9 = scmp.ne.s32.totalorder %s777_s27, %s514_s3  ;;  %p519_p6 = scmp.lt.u32.totalorder %s777_s27, %s828_s2 }
  0x71   : > { %p520_p13 = scmp.lt.u32.totalorder %s518_s18, %s514_s3  ;;  %p522_p8 = scmp.lt.u32.totalorder %s514_s3, %s777_s27 }
  0x72   : > { %p516_p11 = pnand %p515_p9, %p841_p0 }
  0x73   : > { %p521_p5 = por %p520_p13, %p519_p6 }
  0x74   : > { %p517_p3 = pneg %p516_p11 }
  0x75   : > { %p523_p7 = por %p522_p8, %p521_p5 }
  0x77   : > { %p524_p4 = pnand %p523_p7, %p517_p3 }
  0x79   : > { %527 = shalt.err (!%p524_p4)
}
  0x7a   : > { %374 = dma.vmem_to_hbm [thread:$0]  (%p841_p0), %s779_s30, 128, %s777_s27, %s238_s28  }
  0x7b PF: > { %s263_s5 = sand.u32 1, %s566_s9   ;;  %p842_p10 = scmp.ne.s32.totalorder %s834_s24, 0 }
  0x7c   : > { %p843_p12 = scmp.ge.s32.totalorder %s586_s14, 2  ;;  %s264_s16 = scalar_lea.sflag [#allocation4], %s263_s5 }
  0x7e   : > { %p384_p1 = pnand %p843_p12, %p842_p10 }
  0x80   : > { %561 = dma.done.wait (!%p384_p1), %s264_s16, 128  }
  0x81   : > { %563 = vsyncadd (!%p384_p1), %s264_s16, 4294967168  ;;  %s21_s14 = sadd.s32 1, %s586_s14   ;;  %s844_s9 = smov %s570_s10 }
  0x82   : > { %p18_p2 = scmp.ge.s32.totalorder %s21_s14, 4   ;;  %s845_s10 = smov %s574_s11 }
  0x83   : > { %s846_s11 = smov %s662_s23  ;;  %s847_s12 = smov %s582_s13 }
  0x84   : > { %s848_s13 = smov %s850_s17  ;;  %20 = sbr.rel (!%p18_p2) target bundleno = 8 (0x8), region = 90 }
  0x8b   :  { %269 = vsyncpa [#allocation3], 1 }
  0x8c   :  { %271 = vsyncpa [#allocation3 + $0x1], 1 }
  0x8d   :  { %272 = vsyncpa [#allocation6], 1 }
  0x8e   :  { %274 = vsyncpa [#allocation6 + $0x1], 1 }
  0x8f   :  { %275 = vsyncpa [#allocation4], 1 }
  0x90   :  { %277 = vsyncpa [#allocation4 + $0x1], 1 }

</bundles_post_ra>
